<compile_context>
chip_gen: v5e
topology: v5e:2x2
jax: 0.10.0
libtpu: 0.0.40
codegen_flags: <defaults>
</compile_context>

<pallas_src>
import functools

import jax
import jax.numpy as jnp
from jax.experimental import pallas as pl
from jax.experimental.pallas import tpu as pltpu


def _round_up(a, b):
    return ((a + b - 1) // b) * b


def _shared_mlp_kernel(w_ref, shift_ref, x_ref, o_ref, *, use_relu):
    # w_ref:     (C_out, C_in)  BN-scale-folded 1x1 conv weight
    # shift_ref: (C_out, 1)     fused conv-bias + BN shift (f32)
    # x_ref:     (C_in, tS)     one batch's spatial tile (NCHW-native)
    # o_ref:     (C_out, tS)    lane-dense output tile
    y = jnp.dot(w_ref[...], x_ref[...], preferred_element_type=jnp.float32)
    y = y + shift_ref[...]
    if use_relu:
        y = jnp.maximum(y, 0.0)
    o_ref[...] = y.astype(o_ref.dtype)


def shared_mlp_pallas(x, weight, bias, bn_params=None, activation="relu",
                      spatial_tile=4096, out_dtype=None):
    """Forward of SharedMLP.

    x:       (B, C_in, N, K)  NCHW, as in the PyTorch module
    weight:  (C_out, C_in)    1x1 conv weight (kernel_size=1 squeezed)
    bias:    (C_out,)
    bn_params: None or dict with gamma, beta, running_mean, running_var, eps
               (BatchNorm2d inference semantics)
    activation: None or "relu"
    out_dtype: output dtype (defaults to x.dtype). Pass jnp.bfloat16 (and feed
               bf16 x) to halve HBM traffic when the surrounding model allows.
    returns: (B, C_out, N, K)
    """
    if activation not in (None, "relu"):
        raise ValueError(f"Unsupported activation: {activation!r}")

    B, C_in, N, K = x.shape
    C_out = weight.shape[0]
    S = N * K
    out_dtype = x.dtype if out_dtype is None else jnp.dtype(out_dtype)

    # ---- Fold conv bias + inference BatchNorm into weight-scale and shift ----
    weight = weight.astype(jnp.float32)
    bias = bias.astype(jnp.float32)
    if bn_params is not None:
        gamma = bn_params["gamma"].astype(jnp.float32)
        beta = bn_params["beta"].astype(jnp.float32)
        mean = bn_params["running_mean"].astype(jnp.float32)
        var = bn_params["running_var"].astype(jnp.float32)
        inv_std = 1.0 / jnp.sqrt(var + bn_params["eps"])
        scale = gamma * inv_std                      # (C_out,)
        shift = (bias - mean) * scale + beta         # (C_out,)
    else:
        scale = jnp.ones((C_out,), jnp.float32)
        shift = bias
    # BN scale folded into the weight once in the wrapper (outside the hot
    # loop); match the activation dtype so bf16 inputs hit the MXU natively
    # (accumulation stays f32 inside the kernel).
    w_scaled = (weight * scale[:, None]).astype(x.dtype)      # (C_out, C_in)
    shift2 = shift.reshape(C_out, 1)                           # (C_out, 1) f32

    # ---- NCHW -> (B, C_in, S): free reshape, no HBM transposes ----
    x3 = x.reshape(B, C_in, S)

    x_bytes = jnp.dtype(x.dtype).itemsize
    o_bytes = jnp.dtype(out_dtype).itemsize
    w_bytes = jnp.dtype(w_scaled.dtype).itemsize

    # ---- Generation-aware VMEM budget (v7x: 64 MiB/TC; v5e/v6e: 128 MiB) ----
    try:
        vmem_cap = int(pltpu.get_tpu_info().vmem_capacity_bytes)
    except Exception:  # be conservative if the query is unavailable
        vmem_cap = 64 << 20
    if vmem_cap <= (64 << 20):
        tile_budget, vmem_cap_limit = 20 << 20, 40 << 20      # v7x-class
    else:
        tile_budget, vmem_cap_limit = 64 << 20, 100 << 20     # v5e / v6e

    # ---- Honest VMEM estimate: account for (8, 128) lane/sublane padding ----
    cin_rows = _round_up(C_in, 8)
    cout_rows = _round_up(C_out, 8)
    cin_lanes = _round_up(C_in, 128)

    def _vmem_est(t):
        x_tile = cin_rows * t * x_bytes          # one x buffer
        o_tile = cout_rows * t * o_bytes         # one out buffer
        w_tile = cout_rows * cin_lanes * w_bytes
        sh_tile = cout_rows * 128 * 4
        # x/out are double-buffered by the pipeline; the constant-index weight
        # and shift also get two buffers by default, so count them twice too.
        return 2 * (x_tile + o_tile + w_tile + sh_tile)

    # ---- Spatial (lane) tile: as big as the budget allows, multiple of 128 ----
    per_col = 2 * (cin_rows * x_bytes + cout_rows * o_bytes)
    fixed = 2 * (cout_rows * cin_lanes * w_bytes + cout_rows * 128 * 4)
    t_max = max((tile_budget - fixed) // max(per_col, 1), 128)
    tS = min(int(spatial_tile), int(t_max))
    tS = max((tS // 128) * 128, 128)             # shrink in multiples of 128
    if S <= tS:
        tS = S                                    # single full-extent block

    # Spatial axis leads so the v7x megacore split is balanced for any B.
    grid = (pl.cdiv(S, tS), B)
    kernel = functools.partial(_shared_mlp_kernel,
                               use_relu=(activation == "relu"))

    est = _vmem_est(tS)
    vmem_limit = int(min(max(est + (4 << 20), 32 << 20), vmem_cap_limit))
    if vmem_limit < est + (2 << 20):              # pathological channel counts
        vmem_limit = int(min(est + (2 << 20), vmem_cap))

    cost = pl.CostEstimate(
        flops=2 * B * S * C_in * C_out,
        transcendentals=0,
        bytes_accessed=(B * C_in * S * x_bytes
                        + C_out * C_in * w_bytes + C_out * 4
                        + B * C_out * S * o_bytes),
    )

    y3 = pl.pallas_call(
        kernel,
        out_shape=jax.ShapeDtypeStruct((B, C_out, S), out_dtype),
        grid_spec=pltpu.PrefetchScalarGridSpec(
            num_scalar_prefetch=0,
            grid=grid,
            in_specs=[
                pl.BlockSpec((C_out, C_in), lambda s, b: (0, 0)),   # weight (resident)
                pl.BlockSpec((C_out, 1), lambda s, b: (0, 0)),      # shift  (resident)
                pl.BlockSpec((None, C_in, tS), lambda s, b: (b, 0, s)),
            ],
            out_specs=pl.BlockSpec((None, C_out, tS), lambda s, b: (b, 0, s)),
        ),
        compiler_params=pltpu.CompilerParams(
            dimension_semantics=("parallel", "parallel"),
            vmem_limit_bytes=vmem_limit,
        ),
        cost_estimate=cost,
    )(w_scaled, shift2, x3)

    return y3.reshape(B, C_out, N, K)


def shared_mlp_ref(x, weight, bias, bn_params=None, activation="relu"):
    """Pure-JAX reference (matches PyTorch Conv2d(k=1) + BN(eval) + act)."""
    y = jnp.einsum("bchw,oc->bohw", x, weight) + bias[None, :, None, None]
    if bn_params is not None:
        g = bn_params["gamma"][None, :, None, None]
        b = bn_params["beta"][None, :, None, None]
        m = bn_params["running_mean"][None, :, None, None]
        v = bn_params["running_var"][None, :, None, None]
        y = (y - m) / jnp.sqrt(v + bn_params["eps"]) * g + b
    if activation == "relu":
        y = jnp.maximum(y, 0.0)
    return y


if __name__ == "__main__":
    # Small shapes consistent with SharedMLP's (B, d_in, N, K) convention.
    B, C_in, C_out, N, K = 2, 4, 8, 16, 16

    key = jax.random.PRNGKey(0)
    kx, kw, kb, kg, kbe, km, kv = jax.random.split(key, 7)

    x = jax.random.normal(kx, (B, C_in, N, K), dtype=jnp.float32)

    # Deterministic synthetic parameters.
    weight = jax.random.normal(kw, (C_out, C_in), dtype=jnp.float32) * 0.1
    bias = jax.random.normal(kb, (C_out,), dtype=jnp.float32) * 0.1
    bn_params = {
        "gamma": 1.0 + 0.1 * jax.random.normal(kg, (C_out,), dtype=jnp.float32),
        "beta": 0.1 * jax.random.normal(kbe, (C_out,), dtype=jnp.float32),
        "running_mean": 0.1 * jax.random.normal(km, (C_out,), dtype=jnp.float32),
        "running_var": jnp.abs(1.0 + 0.1 * jax.random.normal(kv, (C_out,), dtype=jnp.float32)),
        "eps": 1e-6,  # matches BatchNorm2d(eps=1e-06) in the module
    }

    # Conv + BN(eval) + ReLU path.
    y = shared_mlp_pallas(x, weight, bias, bn_params=bn_params, activation="relu")
    y = jax.block_until_ready(y)
    y_ref = shared_mlp_ref(x, weight, bias, bn_params=bn_params, activation="relu")
    assert y.shape == (B, C_out, N, K)
    assert jnp.allclose(y, y_ref, atol=1e-4, rtol=1e-4)

    # No-BN / no-activation path.
    y2 = jax.block_until_ready(
        shared_mlp_pallas(x, weight, bias, bn_params=None, activation=None))
    y2_ref = shared_mlp_ref(x, weight, bias, bn_params=None, activation=None)
    assert jnp.allclose(y2, y2_ref, atol=1e-4, rtol=1e-4)

    # Ragged spatial-tile path (S % tS != 0): exercises the masked boundary
    # store that replaced the old wrapper-side pad/slice HBM passes.
    N2, K2 = 20, 16  # S = 320, forced tile 256 -> final block has 64 valid lanes
    x_r = jax.random.normal(kx, (B, C_in, N2, K2), dtype=jnp.float32)
    y3 = jax.block_until_ready(
        shared_mlp_pallas(x_r, weight, bias, bn_params=bn_params,
                          activation="relu", spatial_tile=256))
    y3_ref = shared_mlp_ref(x_r, weight, bias, bn_params=bn_params, activation="relu")
    assert y3.shape == (B, C_out, N2, K2)
    assert jnp.allclose(y3, y3_ref, atol=1e-4, rtol=1e-4)

    print("KERNEL_OK")
</pallas_src>

<mosaic_0001>
module attributes {stable_mosaic.version = 11 : i64} {
  func.func @_shared_mlp_kernel(%arg0: i32, %arg1: i32, %arg2: memref<8x4xf32, #tpu.memory_space<vmem>>, %arg3: memref<8x1xf32, #tpu.memory_space<vmem>>, %arg4: memref<1x4x256xf32, #tpu.memory_space<vmem>>, %arg5: memref<1x8x256xf32, #tpu.memory_space<vmem>>) attributes {dimension_semantics = [#tpu.dimension_semantics<parallel>, #tpu.dimension_semantics<parallel>], iteration_bounds = array<i64: 1, 2>, scalar_prefetch = 0 : i64, scratch_operands = 0 : i64, tpu.core_type = #tpu.core_type<tc>, window_params = [{pipeline_mode = #tpu.pipeline_mode<synchronous>, transform_indices = @transform_0, window_bounds = array<i64: 8, 4>}, {pipeline_mode = #tpu.pipeline_mode<synchronous>, transform_indices = @transform_1, window_bounds = array<i64: 8, 1>}, {transform_indices = @transform_2, window_bounds = array<i64: 1, 4, 256>}, {transform_indices = @transform_3, window_bounds = array<i64: 1, 8, 256>}]} {
    %c0 = arith.constant 0 : index
    %c0_0 = arith.constant 0 : index
    %0 = vector.load %arg2[%c0, %c0_0] : memref<8x4xf32, #tpu.memory_space<vmem>>, vector<8x4xf32>
    %c0_1 = arith.constant 0 : index
    %c0_2 = arith.constant 0 : index
    %c0_3 = arith.constant 0 : index
    %1 = vector.load %arg4[%c0_1, %c0_2, %c0_3] : memref<1x4x256xf32, #tpu.memory_space<vmem>>, vector<1x4x256xf32>
    %2 = vector.shape_cast %1 : vector<1x4x256xf32> to vector<4x256xf32>
    %cst = arith.constant dense<0.000000e+00> : vector<8x256xf32>
    %3 = tpu.matmul %0, %2, %cst {dimension_numbers = #tpu.dot_dimension_numbers<[1], [0], [0], [1], [0, 0, 1, 1], [], []>} : vector<8x4xf32>, vector<4x256xf32>, vector<8x256xf32> -> vector<8x256xf32>
    %c0_4 = arith.constant 0 : index
    %c0_5 = arith.constant 0 : index
    %4 = vector.load %arg3[%c0_4, %c0_5] : memref<8x1xf32, #tpu.memory_space<vmem>>, vector<8x1xf32>
    %5 = vector.broadcast %4 : vector<8x1xf32> to vector<8x256xf32>
    %6 = arith.addf %3, %5 : vector<8x256xf32>
    %cst_6 = arith.constant 0.000000e+00 : f32
    %7 = vector.broadcast %cst_6 : f32 to vector<8x256xf32>
    %8 = arith.maximumf %6, %7 : vector<8x256xf32>
    %c0_7 = arith.constant 0 : index
    %c0_8 = arith.constant 0 : index
    %c0_9 = arith.constant 0 : index
    %9 = vector.load %arg5[%c0_7, %c0_8, %c0_9] : memref<1x8x256xf32, #tpu.memory_space<vmem>>, vector<1x8x256xf32>
    %10 = vector.shape_cast %9 : vector<1x8x256xf32> to vector<8x256xf32>
    %11 = vector.shape_cast %8 : vector<8x256xf32> to vector<1x8x256xf32>
    tpu.vector_store %arg5[%c0_7, %c0_8, %c0_9], %11 {strides = array<i32>} : memref<1x8x256xf32, #tpu.memory_space<vmem>>, vector<1x8x256xf32>,
    return
  }
  func.func @transform_0(%arg0: i32, %arg1: i32) -> (i32, i32) {
    %c0_i32 = arith.constant 0 : i32
    %c0_i32_0 = arith.constant 0 : i32
    %c0_i32_1 = arith.constant 0 : i32
    return %c0_i32, %c0_i32_0 : i32, i32
  }
  func.func @transform_1(%arg0: i32, %arg1: i32) -> (i32, i32) {
    %c0_i32 = arith.constant 0 : i32
    %c0_i32_0 = arith.constant 0 : i32
    %c0_i32_1 = arith.constant 0 : i32
    return %c0_i32, %c0_i32_0 : i32, i32
  }
  func.func @transform_2(%arg0: i32, %arg1: i32) -> (i32, i32, i32) {
    %c0_i32 = arith.constant 0 : i32
    %c0_i32_0 = arith.constant 0 : i32
    return %arg1, %c0_i32, %arg0 : i32, i32, i32
  }
  func.func @transform_3(%arg0: i32, %arg1: i32) -> (i32, i32, i32) {
    %c0_i32 = arith.constant 0 : i32
    %c0_i32_0 = arith.constant 0 : i32
    return %arg1, %c0_i32, %arg0 : i32, i32, i32
  }
}

</mosaic_0001>

<bundles_post_ra>
// kernel: tpu_custom_call.1
= control target key start
LH: loop header
LB: loop body
LE: loop exit
PB: predicated region body
PF: predicated region fallthrough
CT: control target
= control target key end

     0   :  { %8 = vsyncpa [#allocation3], 0  ;;  %s640_s0 = inlined_call_operand.vmem [shape: f32[8,4], index: 0, kind: input, shape index: {}]   ;;  %s641_s1 = inlined_call_operand.vmem [shape: f32[8,1], index: 1, kind: input, shape index: {}]   ;;  %s642_s2 = inlined_call_operand.vmem [shape: f32[2,4,256], index: 2, kind: input, shape index: {}]   ;;  %s643_s3 = inlined_call_operand.hbm [shape: f32[2,8,256], index: 3, kind: output, shape index: {}]  }
   0x1   :  { %10 = vsyncpa [#allocation3 + $0x1], 0  ;;  %s537_s12 = smov 0   ;;  %s539_s13 = smov 0  }
   0x2   :  { %s541_s14 = smov 0   ;;  %s543_s15 = smov 0  }
   0x3   :  { %s545_s16 = smov 0   ;;  %s547_s17 = smov 0  }
   0x4 LB: > { %s360_s18 = sadd.s32 4294967295, %s514_s17   ;;  %s361_s19 = sadd.s32 4294967294, %s514_s17   ;;  %s514_s17 = sphi %s547_s17, %s16_s17   ;;  %s510_s16 = sphi %s545_s16, %s650_s16   ;;  %s506_s15 = sphi %s543_s15, %s649_s15   ;;  %s502_s14 = sphi %s541_s14, %s648_s14   ;;  %s498_s13 = sphi %s539_s13, %s647_s13   ;;  %s494_s12 = sphi %s537_s12, %s646_s12  }
   0x5   : > { %s25_s20 = sadd.s32 1, %s510_s16  ;;  %s107_s21 = sadd.s32 1, %s502_s14 }
   0x6   : > { %p26_p0 = scmp.ge.s32.totalorder %s25_s20, 2  ;;  %p117_p1 = scmp.ne.s32.totalorder %s502_s14, %s498_s13 }
   0x7   : > { %p118_p2 = scmp.eq.s32.totalorder %s360_s18, 1  ;;  %p123_p3 = scmp.ne.s32.totalorder %s498_s13, %s494_s12 }
   0x8   : > { %s652_s20 = smov (%p26_p0, %s25_s20), 0  ;;  %p124_p5 = scmp.eq.s32.totalorder %s361_s19, 1 }
   0x9   : > { %p577_p4 = por %p118_p2, %p117_p1  ;;  %s102_s23 = ssub.s32 %s510_s16, %s652_s20 }
   0xa   : > { %p364_p6 = scmp.ge.s32.totalorder %s514_s17, 1  ;;  %p105_p7 = scmp.eq.s32.totalorder %s102_s23, 0 }
   0xb   : > { %p584_p8 = por %p124_p5, %p123_p3  ;;  %p161_p9 = scmp.lt.s32.totalorder %s514_s17, 3 }
   0xc   : > { %s590_s25 = scalar_select %p105_p7, %s502_s14, %s107_s21  }
   0xd   : > { %p162_p10 = pnand %p364_p6, %p161_p9 }
   0xe   : > { %p190_p11 = scmp.lt.s32.totalorder (!%p162_p10), %s506_s15, 1  ;;  %s186_s8 = sand.u32 (!%p162_p10), 1, %s498_s13  }
   0xf   : > { %165 = sbr.rel (%p162_p10) target bundleno = 168 (0xa8), region = 32  ;;  %s365_s9 = sshll.u32 (!%p162_p10), %s186_s8, 4 }
  0x10   : > { %s378_s10 = sshll.u32 (!%p162_p10), %s506_s15, 4  ;;  %s188_s21 = scalar_lea.vmem (!%p162_p10), [#allocation2], %s365_s9 }
  0x11   : > { %s279_s19 = scalar_lea.hbm (!%p162_p10), %s643_s3, %s378_s10  ;;  %s281_s23 = sshll.u32 (!%p162_p10), %s188_s21, 4  ;;  %s282_s23 = int_to_ptr.vmem [resolvable:$true] %s281_s23 }
  0x12   : > { %s283_s26 = sshll.u32 (!%p162_p10), %s279_s19, 4  ;;  %s456_s4 = scalar_lea.hbm (!%p162_p10), %s643_s3, 32  ;;  %s284_s26 = int_to_ptr.hbm [resolvable:$true] %s283_s26 }
  0x13   : > { %s450_s27 = sshra.s32 (!%p162_p10), %s284_s26, 4  ;;  %s451_s27 = int_to_ptr.hbm [resolvable:$true] %s450_s27 }
  0x14   : > { %v202_v0 = vld [vmem:[%s641_s1] sm:$0xff]  ;;  %v516_v1 = vmov 0   ;;  %s191_s28 = scalar_select %p190_p11, %s506_s15, 1  ;;  %vm216_vm0 = vcmask 1043456   ;;  %vm212_vm1 = vcmask 31744  }
  0x15   : > { %435 = vset.pattern.permute.xlu0 %v516_v1  ;;  %v200_v3 = vld [vmem:[%s640_s0] sm:$0xff]  ;;  %s266_s15 = scalar_lea.sflag [#allocation3], %s186_s8  ;;  %p457_p1 = scmp.lt.s32.totalorder %s451_s27, %s643_s3 }
  0x16   : > { %205 = vperm.xlu0 %435, %v202_v0   ;;  %s377_s29 = sshll.u32 %s191_s28, 3  ;;  %s452_s28 = scalar_lea.hbm %s451_s27, 16 }
  0x17   : > { %s197_s5 = scalar_lea.vmem %s642_s2, %s377_s29  ;;  %p453_p12 = scmp.ne.s32.totalorder %s451_s27, %s452_s28 }
  0x18   : > { %v201_v2 = vld [vmem:[%s197_s5] sm:$0xff]  ;;  %p458_p2 = scmp.lt.s32.totalorder %s456_s4, %s452_s28 }
  0x19   : > { %209 = vst [vmem:[#allocation1] ss:$2 sm:$0xff] %v201_v2  ;;  %p454_p13 = pnand %p453_p12, %p577_p4 }
  0x1a   : > { %p459_p3 = por %p458_p2, %p457_p1 }
  0x1b   : > { %p455_p0 = pneg %p454_p13 }
  0x1d   : > { %p460_p5 = pnand %p459_p3, %p455_p0 }
  0x20   : > { %v210_v4 = vld.sshfl [vmem:[#allocation1] sm:$0xff pattern:$0x75316420]  ;;  %v211_v5 = vld.sshfl [vmem:[#allocation1 + $0x8] sm:$0xff pattern:$0x75316420] }
  0x21   : > { %368 = vmatpush.msk.msra.mxu0 %vm216_vm0, %v210_v4  ;;  %370 = vmatpush.msk.msra.mxu1 %vm216_vm0, %v211_v5 }
  0x22   : > { %369 = vmatmul.msk.f32.vlgmr.msra.gmra.mxu0 %vm212_vm1, %v200_v3  ;;  %371 = vmatmul.msk.f32.vlgmr.msra.gmra.mxu1 %vm212_vm1, %v200_v3 }
  0x88   : > { %v206_v6 = vpop.permute.xlu0 %205 }
  0x9f   : > { %v238_v7 = vpop.f32.mrf.mxu0  ;;  %v258_v8 = vpop.f32.mrf.mxu1 }
  0xa0   : > { %v239_v9 = vadd.f32 %v238_v7, %v206_v6  ;;  %v259_v10 = vadd.f32 %v258_v8, %v206_v6 }
  0xa2   : > { %v261_v11 = vmax.f32 %v239_v9, 0.0  ;;  %v262_v12 = vmax.f32 %v259_v10, 0.0 }
  0xa4   : > { %263 = vst [vmem:[%s188_s21] sm:$0xff] %v261_v11 }
  0xa5   : > { %264 = vst [vmem:[%s188_s21 + $0x8] sm:$0xff] %v262_v12 }
  0xa6   : > { %463 = shalt.err (!%p460_p5)
}
  0xa7   : > { %379 = dma.vmem_to_hbm [thread:$0]  (%p577_p4), %s282_s23, 256, %s284_s26, %s266_s15  }
  0xa8 PF: > { %p385_p6 = scmp.ge.s32.totalorder %s514_s17, 2  ;;  %s295_s7 = sand.u32 1, %s494_s12  }
  0xa9   : > { %s296_s8 = scalar_lea.sflag [#allocation3], %s295_s7 }
  0xaa   : > { %p382_p7 = pnand %p385_p6, %p584_p8 }
  0xac   : > { %p383_p9 = pneg %p382_p7 }
  0xae   : > { %489 = dma.done.wait (%p383_p9), %s296_s8, 256  }
  0xaf   : > { %491 = vsyncadd (%p383_p9), %s296_s8, 4294967040  ;;  %s16_s17 = sadd.s32 1, %s514_s17   ;;  %s646_s12 = smov %s498_s13 }
  0xb0   : > { %p13_p10 = scmp.ge.s32.totalorder %s16_s17, 4   ;;  %s647_s13 = smov %s502_s14 }
  0xb1   : > { %s648_s14 = smov %s590_s25  ;;  %s649_s15 = smov %s510_s16 }
  0xb2   : > { %s650_s16 = smov %s652_s20  ;;  %15 = sbr.rel (!%p13_p10) target bundleno = 4 (0x4), region = 67 }
  0xb7   :  { %302 = vsyncpa [#allocation3], 1 }
  0xb8   :  { %304 = vsyncpa [#allocation3 + $0x1], 1 }

</bundles_post_ra>
